<compile_context>
chip_gen: v6e
topology: v6e:2x2x1
jax: 0.10.0
libtpu: 0.0.40
codegen_flags: <defaults>
</compile_context>

<pallas_src>
import functools

import jax
import jax.numpy as jnp
from jax.experimental import pallas as pl
from jax.experimental.pallas import tpu as pltpu

N_BINS = 15  # matches ECELoss(n_bins=15)


def _round_up(x, m):
    return ((x + m - 1) // m) * m


def ece_tile_kernel(logits_ref, labels_ref, out_ref, *, n_valid):
    """One N-tile: emit per-bin partial sums [count | conf_sum | acc_sum]."""
    x = logits_ref[...].astype(jnp.float32)            # (T, C) f32 (cast once)
    labels = labels_ref[...]                           # (T, 1) int32
    T, C = x.shape

    # confidence = max softmax prob = 1 / sum(exp(x - max)); no probs needed.
    m = jnp.max(x, axis=1, keepdims=True)                       # (T, 1)
    s = jnp.sum(jnp.exp(x - m), axis=1, keepdims=True)          # (T, 1)
    conf = pl.reciprocal(s, approx=False)                       # exact 1/x

    # prediction = first argmax of logits (== argmax of softmax, torch.max tie-break)
    col = jax.lax.broadcasted_iota(jnp.int32, (T, C), 1)
    pred = jnp.min(jnp.where(x >= m, col, C), axis=1, keepdims=True)  # (T, 1)
    correct = pred == labels                                    # (T, 1) bool

    # valid-row mask (tail padding when N is not a multiple of TILE_N)
    row = pl.program_id(0) * T + jax.lax.broadcasted_iota(jnp.int32, (T, 1), 0)
    valid = row < n_valid                                       # (T, 1) bool

    # bin boundaries: linspace(0, 1, n_bins + 1); membership conf in (lo, hi]
    b = jax.lax.broadcasted_iota(jnp.int32, (1, N_BINS), 1).astype(jnp.float32)
    lowers = b * (1.0 / N_BINS)
    uppers = (b + 1.0) * (1.0 / N_BINS)
    in_bin = jnp.where((conf > lowers) & (conf <= uppers) & valid, 1.0, 0.0)  # (T, NB)

    # Fused partials: [count | conf*mask | acc*mask] -> one sublane reduction.
    partial = jnp.concatenate(
        [in_bin, conf * in_bin, jnp.where(correct, in_bin, 0.0)], axis=1
    )                                                           # (T, 3*NB)
    out_ref[...] = jnp.sum(partial, axis=0, keepdims=True).reshape(1, 1, 3 * N_BINS)


def ece_loss(logits, labels, *, tile_n=2048):
    """Pallas implementation of ECELoss.forward. Returns shape (1,) float32."""
    N, C = logits.shape

    # Tile sizing: multiple of 8 sublanes, clamped to the (rounded-up) batch.
    tile_n = min(tile_n, _round_up(N, 8))
    tile_n = _round_up(max(tile_n, 8), 8)
    n_pad = _round_up(N, tile_n)
    num_tiles = n_pad // tile_n

    labels_flat = labels.reshape(-1)
    if n_pad != N:
        logits = jnp.pad(logits, ((0, n_pad - N), (0, 0)))
        labels_flat = jnp.pad(labels_flat, ((0, n_pad - N),), constant_values=-1)
    labels2 = labels_flat.reshape(n_pad, 1).astype(jnp.int32)

    kernel = functools.partial(ece_tile_kernel, n_valid=N)

    partials = pl.pallas_call(
        kernel,
        out_shape=jax.ShapeDtypeStruct((num_tiles, 1, 3 * N_BINS), jnp.float32),
        grid=(num_tiles,),
        in_specs=[
            pl.BlockSpec((tile_n, C), lambda i: (i, 0)),   # native dtype, cast in-kernel
            pl.BlockSpec((tile_n, 1), lambda i: (i, 0)),
        ],
        out_specs=pl.BlockSpec((1, 1, 3 * N_BINS), lambda i: (i, 0, 0)),
        compiler_params=pltpu.CompilerParams(
            dimension_semantics=("parallel",),
        ),
    )(logits, labels2)

    # Trivial final combine (45 floats) in plain JAX.
    parts = jnp.sum(partials.reshape(num_tiles, 3 * N_BINS), axis=0)
    count = parts[0:N_BINS]
    conf_sum = parts[N_BINS:2 * N_BINS]
    acc_sum = parts[2 * N_BINS:3 * N_BINS]

    prop = count / float(N)
    safe = jnp.maximum(count, 1.0)
    ece = jnp.sum(
        jnp.where(count > 0.0, jnp.abs(conf_sum / safe - acc_sum / safe) * prop, 0.0)
    )
    return ece.reshape(1).astype(jnp.float32)


def ece_loss_ref(logits, labels):
    """Pure-JAX reference mirroring the PyTorch module."""
    probs = jax.nn.softmax(logits.astype(jnp.float32), axis=1)
    conf = jnp.max(probs, axis=1)
    pred = jnp.argmax(probs, axis=1)
    acc = (pred == labels).astype(jnp.float32)
    boundaries = jnp.linspace(0.0, 1.0, N_BINS + 1)
    ece = jnp.zeros((1,), jnp.float32)
    n = logits.shape[0]
    for i in range(N_BINS):
        lo, hi = boundaries[i], boundaries[i + 1]
        in_bin = (conf > lo) & (conf <= hi)
        cnt = jnp.sum(in_bin.astype(jnp.float32))
        prop = cnt / n
        safe = jnp.maximum(cnt, 1.0)
        acc_in = jnp.sum(jnp.where(in_bin, acc, 0.0)) / safe
        conf_in = jnp.sum(jnp.where(in_bin, conf, 0.0)) / safe
        ece = ece + jnp.where(cnt > 0, jnp.abs(conf_in - acc_in) * prop, 0.0)
    return ece


if __name__ == "__main__":
    key = jax.random.PRNGKey(0)
    k1, k2 = jax.random.split(key)
    N, C = 100, 16
    logits = jax.random.normal(k1, (N, C), dtype=jnp.float32) * 3.0
    labels = jax.random.randint(k2, (N,), 0, C, dtype=jnp.int32)

    # tile_n=64 -> 2 grid tiles + a masked tail, exercising the streaming path.
    ece = ece_loss(logits, labels, tile_n=64)
    jax.block_until_ready(ece)

    ref = ece_loss_ref(logits, labels)
    assert ece.shape == (1,), ece.shape
    assert jnp.allclose(ece, ref, atol=1e-5), (ece, ref)
    print("KERNEL_OK")
</pallas_src>

<mosaic_0001>
module attributes {stable_mosaic.version = 11 : i64} {
  func.func @ece_tile_kernel(%arg0: i32, %arg1: memref<64x16xf32, #tpu.memory_space<vmem>>, %arg2: memref<64x1xi32, #tpu.memory_space<vmem>>, %arg3: memref<1x1x45xf32, #tpu.memory_space<vmem>>) attributes {dimension_semantics = [#tpu.dimension_semantics<parallel>], iteration_bounds = array<i64: 2>, scalar_prefetch = 0 : i64, scratch_operands = 0 : i64, tpu.core_type = #tpu.core_type<tc>, window_params = [{transform_indices = @transform_0, window_bounds = array<i64: 64, 16>}, {transform_indices = @transform_1, window_bounds = array<i64: 64, 1>}, {transform_indices = @transform_2, window_bounds = array<i64: 1, 1, 45>}]} {
    %c0 = arith.constant 0 : index
    %c0_0 = arith.constant 0 : index
    %0 = vector.load %arg1[%c0, %c0_0] : memref<64x16xf32, #tpu.memory_space<vmem>>, vector<64x16xf32>
    %c0_1 = arith.constant 0 : index
    %c0_2 = arith.constant 0 : index
    %1 = vector.load %arg2[%c0_1, %c0_2] : memref<64x1xi32, #tpu.memory_space<vmem>>, vector<64x1xi32>
    %cst = arith.constant dense<0xFF800000> : vector<64xf32>
    %2 = vector.multi_reduction <maximumf>, %0, %cst [1] : vector<64x16xf32> to vector<64xf32>
    %3 = vector.shape_cast %2 : vector<64xf32> to vector<64x1xf32>
    %4 = vector.broadcast %3 : vector<64x1xf32> to vector<64x16xf32>
    %5 = arith.subf %0, %4 : vector<64x16xf32>
    %6 = math.exp %5 : vector<64x16xf32>
    %cst_3 = arith.constant dense<0.000000e+00> : vector<64xf32>
    %7 = vector.multi_reduction <add>, %6, %cst_3 [1] : vector<64x16xf32> to vector<64xf32>
    %8 = vector.shape_cast %7 : vector<64xf32> to vector<64x1xf32>
    %9 = tpu.reciprocal %8 : vector<64x1xf32> -> vector<64x1xf32>
    %10 = tpu.iota {dimensions = array<i32: 1>} : vector<64x16xi32>
    %11 = vector.broadcast %3 : vector<64x1xf32> to vector<64x16xf32>
    %12 = arith.cmpf oge, %0, %11 : vector<64x16xf32>
    %c16_i32 = arith.constant 16 : i32
    %13 = vector.broadcast %c16_i32 : i32 to vector<64x16xi32>
    %14 = arith.select %12, %10, %13 : vector<64x16xi1>, vector<64x16xi32>
    %cst_4 = arith.constant dense<2147483647> : vector<64xi32>
    %15 = vector.multi_reduction <minsi>, %14, %cst_4 [1] : vector<64x16xi32> to vector<64xi32>
    %16 = vector.shape_cast %15 : vector<64xi32> to vector<64x1xi32>
    %17 = arith.cmpi eq, %16, %1 : vector<64x1xi32>
    %c64_i32 = arith.constant 64 : i32
    %18 = arith.muli %arg0, %c64_i32 : i32
    %19 = tpu.iota {dimensions = array<i32: 0>} : vector<64x1xi32>
    %20 = vector.broadcast %18 : i32 to vector<64x1xi32>
    %21 = arith.addi %20, %19 : vector<64x1xi32>
    %c100_i32 = arith.constant 100 : i32
    %22 = vector.broadcast %c100_i32 : i32 to vector<64x1xi32>
    %23 = arith.cmpi slt, %21, %22 : vector<64x1xi32>
    %24 = tpu.iota {dimensions = array<i32: 1>} : vector<1x15xi32>
    %25 = arith.sitofp %24 : vector<1x15xi32> to vector<1x15xf32>
    %cst_5 = arith.constant 0.0666666701 : f32
    %26 = vector.broadcast %cst_5 : f32 to vector<1x15xf32>
    %27 = arith.mulf %25, %26 : vector<1x15xf32>
    %cst_6 = arith.constant 1.000000e+00 : f32
    %28 = vector.broadcast %cst_6 : f32 to vector<1x15xf32>
    %29 = arith.addf %25, %28 : vector<1x15xf32>
    %cst_7 = arith.constant 0.0666666701 : f32
    %30 = vector.broadcast %cst_7 : f32 to vector<1x15xf32>
    %31 = arith.mulf %29, %30 : vector<1x15xf32>
    %32 = vector.broadcast %9 : vector<64x1xf32> to vector<64x15xf32>
    %33 = vector.broadcast %27 : vector<1x15xf32> to vector<64x15xf32>
    %34 = arith.cmpf ogt, %32, %33 : vector<64x15xf32>
    %35 = vector.broadcast %9 : vector<64x1xf32> to vector<64x15xf32>
    %36 = vector.broadcast %31 : vector<1x15xf32> to vector<64x15xf32>
    %37 = arith.cmpf ole, %35, %36 : vector<64x15xf32>
    %38 = arith.andi %34, %37 : vector<64x15xi1>
    %39 = vector.broadcast %23 : vector<64x1xi1> to vector<64x15xi1>
    %40 = arith.andi %38, %39 : vector<64x15xi1>
    %cst_8 = arith.constant 1.000000e+00 : f32
    %cst_9 = arith.constant 0.000000e+00 : f32
    %41 = vector.broadcast %cst_8 : f32 to vector<64x15xf32>
    %42 = vector.broadcast %cst_9 : f32 to vector<64x15xf32>
    %43 = arith.select %40, %41, %42 : vector<64x15xi1>, vector<64x15xf32>
    %44 = vector.broadcast %9 : vector<64x1xf32> to vector<64x15xf32>
    %45 = arith.mulf %44, %43 : vector<64x15xf32>
    %cst_10 = arith.constant 0.000000e+00 : f32
    %46 = vector.shape_cast %17 : vector<64x1xi1> to vector<64x1xi1>
    %47 = vector.broadcast %46 : vector<64x1xi1> to vector<64x15xi1>
    %48 = vector.broadcast %cst_10 : f32 to vector<64x15xf32>
    %49 = arith.select %47, %43, %48 : vector<64x15xi1>, vector<64x15xf32>
    %50 = tpu.concatenate %43, %45, %49 in 1 : vector<64x15xf32>, vector<64x15xf32>, vector<64x15xf32> -> vector<64x45xf32>
    %cst_11 = arith.constant dense<0.000000e+00> : vector<45xf32>
    %51 = vector.multi_reduction <add>, %50, %cst_11 [0] : vector<64x45xf32> to vector<45xf32>
    %52 = vector.shape_cast %51 : vector<45xf32> to vector<1x45xf32>
    %53 = vector.shape_cast %52 : vector<1x45xf32> to vector<1x1x45xf32>
    %c0_12 = arith.constant 0 : index
    %c0_13 = arith.constant 0 : index
    %c0_14 = arith.constant 0 : index
    %54 = vector.load %arg3[%c0_12, %c0_13, %c0_14] : memref<1x1x45xf32, #tpu.memory_space<vmem>>, vector<1x1x45xf32>
    tpu.vector_store %arg3[%c0_12, %c0_13, %c0_14], %53 {strides = array<i32>} : memref<1x1x45xf32, #tpu.memory_space<vmem>>, vector<1x1x45xf32>,
    return
  }
  func.func @transform_0(%arg0: i32) -> (i32, i32) {
    %c0_i32 = arith.constant 0 : i32
    %c0_i32_0 = arith.constant 0 : i32
    return %arg0, %c0_i32 : i32, i32
  }
  func.func @transform_1(%arg0: i32) -> (i32, i32) {
    %c0_i32 = arith.constant 0 : i32
    %c0_i32_0 = arith.constant 0 : i32
    return %arg0, %c0_i32 : i32, i32
  }
  func.func @transform_2(%arg0: i32) -> (i32, i32, i32) {
    %c0_i32 = arith.constant 0 : i32
    %c0_i32_0 = arith.constant 0 : i32
    %c0_i32_1 = arith.constant 0 : i32
    return %arg0, %c0_i32, %c0_i32_0 : i32, i32, i32
  }
}

</mosaic_0001>

<bundles_post_ra>
// kernel: tpu_custom_call.1
= control target key start
LH: loop header
LB: loop body
LE: loop exit
PB: predicated region body
PF: predicated region fallthrough
CT: control target
= control target key end

     0   :  { %7 = vsyncpa [#allocation3], 0  ;;  %s1345_s0 = inlined_call_operand.vmem [shape: f32[128,16], index: 0, kind: input, shape index: {}]   ;;  %s1346_s1 = inlined_call_operand.vmem [shape: s32[128,1], index: 1, kind: input, shape index: {}]   ;;  %s1347_s2 = inlined_call_operand.hbm [shape: f32[2,1,45], index: 2, kind: output, shape index: {}]  }
   0x1   :  { %9 = vsyncpa [#allocation3 + $0x1], 0  ;;  %s923_s9 = smov 0   ;;  %s925_s10 = smov 0  }
   0x2   :  { %s927_s11 = smov 0   ;;  %s929_s12 = smov 0  }
   0x3 LB: > { %s944_s13 = sadd.s32 4294967295, %s901_s12   ;;  %s737_s14 = sadd.s32 4294967294, %s901_s12   ;;  %s901_s12 = sphi %s929_s12, %s1353_s12   ;;  %s897_s11 = sphi %s927_s11, %s1352_s11   ;;  %s893_s10 = sphi %s925_s10, %s1351_s10   ;;  %s889_s9 = sphi %s923_s9, %s1350_s9  }
   0x4   : > { %s948_s15 = sadd.s32 1, %s901_s12   ;;  %s74_s16 = sadd.s32 1, %s897_s11 }
   0x5   : > { %s71_s17 = ssub.s32 %s901_s12, %s948_s15  ;;  %p84_p0 = scmp.ne.s32.totalorder %s897_s11, %s893_s10 }
   0x6   : > { %p72_p1 = scmp.eq.s32.totalorder %s71_s17, 0  ;;  %p85_p2 = scmp.eq.s32.totalorder %s944_s13, 1 }
   0x7   : > { %p90_p3 = scmp.ne.s32.totalorder %s893_s10, %s889_s9  ;;  %p91_p4 = scmp.eq.s32.totalorder %s737_s14, 1 }
   0x8   : > { %s959_s18 = scalar_select %p72_p1, %s897_s11, %s74_s16  }
   0x9   : > { %p961_p5 = por %p85_p2, %p84_p0  ;;  %p965_p6 = por %p91_p4, %p90_p3 }
   0xa   : > { %p740_p7 = scmp.ge.s32.totalorder %s901_s12, 1  ;;  %p127_p8 = scmp.lt.s32.totalorder %s901_s12, 3 }
   0xc   : > { %p128_p9 = pnand %p740_p7, %p127_p8 }
   0xd   : > { %s741_s21 = sshll.u32 (!%p128_p9), %s944_s13, 3  ;;  %s745_s26 = sshll.u32 (!%p128_p9), %s944_s13, 6 }
   0xe   : > { %131 = sbr.rel (%p128_p9) target bundleno = 754 (0x2f2), region = 28  ;;  %p154_p10 = scmp.lt.s32.totalorder (!%p128_p9), %s741_s21, 15 }
   0xf   : > { %s905_s30 = smov (!%p128_p9), 15   ;;  %s906_s3 = smov (!%p128_p9), 30  }
  0x10   : > { %s151_s4 = sand.u32 (!%p128_p9), 1, %s893_s10   ;;  %s746_s5 = sshll.u32 (!%p128_p9), %s944_s13, 4 }
  0x11   : > { %s152_s6 = scalar_lea.vmem (!%p128_p9), [#allocation2], %s151_s4  ;;  %s668_s16 = scalar_lea.hbm (!%p128_p9), %s1347_s2, %s746_s5 }
  0x12   : > { %s670_s7 = sshll.u32 (!%p128_p9), %s152_s6, 4  ;;  %s658_s17 = scalar_lea.sflag (!%p128_p9), [#allocation3], %s151_s4  ;;  %s671_s7 = int_to_ptr.vmem [resolvable:$true] %s670_s7 }
  0x13   : > { %s1355_s21 = smov (!%p154_p10, %s741_s21), 15  ;;  %vm181_vm0 = vcmask 130048   ;;  %v262_v16 = vlaneseq }
  0x14   : > { %s742_s22 = sshll.u32 %s1355_s21, 3  ;;  %s841_s21 = scalar_lea.vmem %s671_s7, 16 }
  0x15   : > { %s157_s25 = scalar_lea.vmem %s1345_s0, %s742_s22  ;;  %v1013_v17 = vand.u32 127, %v262_v16  ;;  %s1169_s29 = scalar_lea.vmem %s1346_s1, %s742_s22 }
  0x16   : > { %v980_v0 = vld [vmem:[%s157_s25] sm:$0xff]  ;;  %v982_v1 = vld [vmem:[%s157_s25 + $0x10] sm:$0xff]  ;;  %v984_v2 = vld [vmem:[%s157_s25 + $0x8] sm:$0xff]  ;;  %p842_p11 = scmp.ne.s32.totalorder %s671_s7, %s841_s21  ;;  %s907_s22 = smov [#allocation2]  }
  0x17   : > { %v182_v3 = vsel %vm181_vm0, %v980_v0, -inf  ;;  %v188_v4 = vsel %vm181_vm0, %v982_v1, -inf  ;;  %v990_v5 = vld [vmem:[%s157_s25 + $0x18] sm:$0xff]  ;;  %v185_v6 = vsel %vm181_vm0, %v984_v2, -inf  ;;  %v996_v8 = vld [vmem:[%s157_s25 + $0x20] sm:$0xff]  ;;  %v998_v9 = vld [vmem:[%s157_s25 + $0x28] sm:$0xff] }
  0x18   : > { %183 = vmax.xlane.f32.xlu0 %v182_v3  ;;  %189 = vmax.xlane.f32.xlu1 %v188_v4  ;;  %v191_v7 = vsel %vm181_vm0, %v990_v5, -inf  ;;  %v194_v10 = vsel %vm181_vm0, %v996_v8, -inf  ;;  %v197_v11 = vsel %vm181_vm0, %v998_v9, -inf  ;;  %v1004_v12 = vld [vmem:[%s157_s25 + $0x30] sm:$0xff]  ;;  %v1006_v13 = vld [vmem:[%s157_s25 + $0x38] sm:$0xff]  ;;  %p843_p12 = pnand %p842_p11, %p961_p5  ;;  %s845_s23 = sshll.u32 %s907_s22, 4  ;;  %s846_s23 = int_to_ptr.vmem [resolvable:$false] %s845_s23 }
  0x19   : > { %v200_v14 = vsel %vm181_vm0, %v1004_v12, -inf  ;;  %v203_v15 = vsel %vm181_vm0, %v1006_v13, -inf  ;;  %s847_s13 = scalar_lea.vmem %s846_s23, 32  ;;  %p848_p0 = scmp.lt.s32.totalorder %s671_s7, %s846_s23 }
  0x1a   : > { %p844_p13 = pneg %p843_p12  ;;  %p849_p1 = scmp.lt.s32.totalorder %s847_s13, %s841_s21 }
  0x1c   : > { %186 = vmax.xlane.f32.xlu0 %v185_v6  ;;  %192 = vmax.xlane.f32.xlu1 %v191_v7  ;;  %p850_p2 = por %p849_p1, %p848_p0 }
  0x1e   : > { %p851_p3 = pnand %p850_p2, %p844_p13 }
  0x20   : > { %195 = vmax.xlane.f32.xlu0 %v194_v10  ;;  %198 = vmax.xlane.f32.xlu1 %v197_v11 }
  0x24   : > { %201 = vmax.xlane.f32.xlu0 %v200_v14  ;;  %204 = vmax.xlane.f32.xlu1 %v203_v15 }
  0xa1   : > { %v184_v18 = vpop.xlane.xlu0 %183  ;;  %v1015_v19 = vpop.xlane.xlu1 %189 }
  0xa2   : > { %vm264_vm1 = vcmp.ge.f32.partialorder %v980_v0, %v184_v18  ;;  %vm266_vm2 = vcmp.ge.f32.partialorder %v982_v1, %v1015_v19  ;;  %v206_v59 = vsub.f32 %v980_v0, %v184_v18  ;;  %v208_v60 = vsub.f32 %v982_v1, %v1015_v19 }
  0xa3   : > { %v272_v20 = vsel %vm264_vm1, %v1013_v17, 16  ;;  %v274_v21 = vsel %vm266_vm2, %v1013_v17, 16 }
  0xa4   : > { %v280_v22 = vsel %vm181_vm0, %v272_v20, 2147483647  ;;  %v310_v26 = vsel %vm181_vm0, %v274_v21, 2147483647  ;;  %v214_v3 = vmul.f32 1.442695, %v206_v59 }
  0xa5   : > { %v1023_v23 = vpop.xlane.xlu0 %186  ;;  %v1025_v24 = vpop.xlane.xlu1 %192  ;;  %v282_v25 = vshra.s32 %v280_v22, 16  ;;  %v312_v30 = vshra.s32 %v310_v26, 16  ;;  %v281_v58 = vand.u32 65535, %v280_v22  ;;  %v311_v63 = vand.u32 65535, %v310_v26 }
  0xa6   : > { %vm265_vm3 = vcmp.ge.f32.partialorder %v984_v2, %v1023_v23  ;;  %vm267_vm4 = vcmp.ge.f32.partialorder %v990_v5, %v1025_v24  ;;  %v207_v4 = vsub.f32 %v984_v2, %v1023_v23  ;;  %v209_v6 = vsub.f32 %v990_v5, %v1025_v24 }
  0xa7   : > { %v273_v27 = vsel %vm265_vm3, %v1013_v17, 16  ;;  %v284_v28 = vcvt.s32.f32 %v282_v25  ;;  %v275_v29 = vsel %vm267_vm4, %v1013_v17, 16  ;;  %v314_v36 = vcvt.s32.f32 %v312_v30 }
  0xa8   : > { %v295_v33 = vsel %vm181_vm0, %v273_v27, 2147483647  ;;  %v1042_v34 = vsel %vm181_vm0, %v275_v29, 2147483647  ;;  %v283_v62 = vcvt.s32.f32 %v281_v58  ;;  %v218_v0 = vmul.f32 1.442695, %v208_v60 }
  0xa9   : > { %285 = vmin.xlane.f32.xlu0 %v284_v28  ;;  %v1034_v31 = vpop.xlane.xlu0 %195  ;;  %v1036_v32 = vpop.xlane.xlu1 %198  ;;  %v297_v38 = vshra.s32 %v295_v33, 16  ;;  %v327_v41 = vshra.s32 %v1042_v34, 16  ;;  %v296_v10 = vand.u32 65535, %v295_v33  ;;  %v313_v14 = vcvt.s32.f32 %v311_v63 }
  0xaa   : > { %vm268_vm5 = vcmp.ge.f32.partialorder %v996_v8, %v1034_v31  ;;  %vm269_vm6 = vcmp.ge.f32.partialorder %v998_v9, %v1036_v32  ;;  %v210_v1 = vsub.f32 %v996_v8, %v1034_v31  ;;  %809 = vpow2.f32 %v214_v3 }
  0xab   : > { %v276_v35 = vsel %vm268_vm5, %v1013_v17, 16  ;;  %v277_v37 = vsel %vm269_vm6, %v1013_v17, 16  ;;  %v299_v43 = vcvt.s32.f32 %v297_v38  ;;  %v1065_v47 = vcvt.s32.f32 %v327_v41 }
  0xac   : > { %v1054_v42 = vsel %vm181_vm0, %v276_v35, 2147483647  ;;  %v1059_v44 = vsel %vm181_vm0, %v277_v37, 2147483647  ;;  %v216_v15 = vmul.f32 1.442695, %v207_v4  ;;  %v298_v20 = vcvt.s32.f32 %v296_v10 }
  0xad   : > { %315 = vmin.xlane.f32.xlu0 %v314_v36  ;;  %v1048_v39 = vpop.xlane.xlu0 %201  ;;  %v1050_v40 = vpop.xlane.xlu1 %204  ;;  %300 = vmin.xlane.f32.xlu1 %v299_v43  ;;  %v342_v48 = vshra.s32 %v1054_v42, 16  ;;  %v357_v49 = vshra.s32 %v1059_v44, 16  ;;  %v220_v2 = vmul.f32 1.442695, %v209_v6  ;;  %v326_v5 = vand.u32 65535, %v1042_v34 }
  0xae   : > { %vm270_vm7 = vcmp.ge.f32.partialorder %v1004_v12, %v1048_v39  ;;  %vm271_vm8 = vcmp.ge.f32.partialorder %v1006_v13, %v1050_v40  ;;  %v341_v21 = vand.u32 65535, %v1054_v42  ;;  %811 = vpow2.f32 %v218_v0 }
  0xaf   : > { %v278_v45 = vsel %vm270_vm7, %v1013_v17, 16  ;;  %v279_v46 = vsel %vm271_vm8, %v1013_v17, 16  ;;  %v344_v51 = vcvt.s32.f32 %v342_v48  ;;  %v1077_v54 = vcvt.s32.f32 %v357_v49 }
  0xb0   : > { %v1070_v50 = vsel %vm181_vm0, %v278_v45, 2147483647  ;;  %v1074_v53 = vsel %vm181_vm0, %v279_v46, 2147483647  ;;  %v222_v22 = vmul.f32 1.442695, %v210_v1  ;;  %v211_v8 = vsub.f32 %v998_v9, %v1036_v32 }
  0xb1   : > { %v372_v52 = vshra.s32 %v1070_v50, 16  ;;  %330 = vmin.xlane.f32.xlu1 %v1065_v47  ;;  %345 = vmin.xlane.f32.xlu0 %v344_v51  ;;  %v387_v56 = vshra.s32 %v1074_v53, 16  ;;  %813 = vpow2.f32 %v216_v15  ;;  %v212_v23 = vsub.f32 %v1004_v12, %v1048_v39 }
  0xb2   : > { %815 = vpow2.f32 %v220_v2  ;;  %v328_v27 = vcvt.s32.f32 %v326_v5  ;;  %v356_v29 = vand.u32 65535, %v1059_v44  ;;  %v371_v30 = vand.u32 65535, %v1070_v50  ;;  %v173_v2 = vld [vmem:[%s1169_s29] sm:$0xff] }
  0xb3   : > { %v1079_v55 = vcvt.s32.f32 %v372_v52  ;;  %v1084_v57 = vcvt.s32.f32 %v387_v56  ;;  %817 = vpow2.f32 %v222_v22  ;;  %v224_v9 = vmul.f32 1.442695, %v211_v8 }
  0xb4   : > { %v226_v12 = vmul.f32 1.442695, %v212_v23  ;;  %v213_v31 = vsub.f32 %v1006_v13, %v1050_v40  ;;  %v373_v37 = vcvt.s32.f32 %v371_v30  ;;  %v386_v38 = vand.u32 65535, %v1074_v53 }
  0xb5   : > { %360 = vmin.xlane.f32.xlu1 %v1077_v54  ;;  %375 = vmin.xlane.f32.xlu0 %v1079_v55  ;;  %819 = vpow2.f32 %v224_v9  ;;  %v903_v49 = vmov 0   ;;  %v1151_v4 = vstv %s745_s26 }
  0xb6   : > { %821 = vpow2.f32 %v226_v12  ;;  %v228_v13 = vmul.f32 1.442695, %v213_v31  ;;  %792 = vset.pattern.permute.xlu0 %v903_v49  ;;  %793 = vset.pattern.permute.xlu1 %v903_v49 }
  0xb7   : > { %v810_v41 = vpop.eup %809 }
  0xb8   : > { %823 = vpow2.f32 %v228_v13  ;;  %v230_v46 = vsel %vm181_vm0, %v810_v41, 0.0 }
  0xb9   : > { %390 = vmin.xlane.f32.xlu1 %v1084_v57 }
  0xbb   : > { %v812_v44 = vpop.eup %811 }
  0xbc   : > { %v236_v52 = vsel %vm181_vm0, %v812_v44, 0.0 }
 0x132   : > { %v1090_v61 = vpop.xlane.xlu0 %285 }
 0x133   : > { %vm287_vm9 = vcmp.eq.f32.partialorder %v284_v28, %v1090_v61  ;;  %v343_v28 = vcvt.s32.f32 %v341_v21 }
 0x134   : > { %v288_v7 = vsel %vm287_vm9, %v283_v62, inf  ;;  %v1147_v62 = vshrl.u32 %v262_v16, 7  ;;  %v292_v16 = vcvt.f32.s32 %v1090_v61 }
 0x135   : > { %289 = vmin.xlane.f32.xlu0 %v288_v7 }
 0x136   : > { %v1099_v11 = vpop.xlane.xlu0 %315  ;;  %v1102_v19 = vpop.xlane.xlu1 %300  ;;  %v415_v63 = vadd.s32 40, %v1147_v62  ;;  %v416_v3 = vadd.s32 48, %v1147_v62  ;;  %v417_v10 = vadd.s32 56, %v1147_v62 }
 0x137   : > { %vm317_vm10 = vcmp.eq.f32.partialorder %v314_v36, %v1099_v11  ;;  %vm302_vm11 = vcmp.eq.f32.partialorder %v299_v43, %v1102_v19  ;;  %v358_v36 = vcvt.s32.f32 %v356_v29  ;;  %v388_v43 = vcvt.s32.f32 %v386_v38  ;;  %v174_v29 = vld [vmem:[%s1169_s29 + $0x8] sm:$0xff] }
 0x138   : > { %v318_v18 = vsel %vm317_vm10, %v313_v14, inf  ;;  %v303_v24 = vsel %vm302_vm11, %v298_v20, inf  ;;  %v1154_v6 = vadd.s32 %v1151_v4, %v415_v63  ;;  %v1157_v7 = vadd.s32 %v1151_v4, %v416_v3 }
 0x139   : > { %319 = vmin.xlane.f32.xlu0 %v318_v18  ;;  %304 = vmin.xlane.f32.xlu1 %v303_v24  ;;  %v1161_v0 = vadd.s32 %v1151_v4, %v417_v10  ;;  %v293_v14 = vshll.u32 %v292_v16, 16  ;;  %v307_v20 = vcvt.f32.s32 %v1102_v19  ;;  %v322_v5 = vcvt.f32.s32 %v1099_v11  ;;  %v175_v11 = vld [vmem:[%s1169_s29 + $0x10] sm:$0xff] }
 0x13a   : > { %v1111_v25 = vpop.xlane.xlu1 %330  ;;  %v1113_v26 = vpop.xlane.xlu0 %345 }
 0x13b   : > { %vm332_vm12 = vcmp.eq.f32.partialorder %v1065_v47, %v1111_v25  ;;  %vm347_vm13 = vcmp.eq.f32.partialorder %v344_v51, %v1113_v26  ;;  %v814_v47 = vpop.eup %813  ;;  %v308_v23 = vshll.u32 %v307_v20, 16  ;;  %v323_v24 = vshll.u32 %v322_v5, 16 }
 0x13c   : > { %v333_v32 = vsel %vm332_vm12, %v328_v27, inf  ;;  %v348_v33 = vsel %vm347_vm13, %v343_v28, inf  ;;  %v816_v48 = vpop.eup %815  ;;  %v233_v51 = vsel %vm181_vm0, %v814_v47, 0.0  ;;  %v337_v27 = vcvt.f32.s32 %v1111_v25  ;;  %v177_v47 = vld [vmem:[%s1169_s29 + $0x20] sm:$0xff] }
 0x13d   : > { %334 = vmin.xlane.f32.xlu1 %v333_v32  ;;  %349 = vmin.xlane.f32.xlu0 %v348_v33  ;;  %v818_v50 = vpop.eup %817  ;;  %v352_v32 = vcvt.f32.s32 %v1113_v26 }
 0x13e   : > { %v1122_v34 = vpop.xlane.xlu1 %360  ;;  %v1124_v35 = vpop.xlane.xlu0 %375  ;;  %v338_v31 = vshll.u32 %v337_v27, 16 }
 0x13f   : > { %vm362_vm14 = vcmp.eq.f32.partialorder %v1077_v54, %v1122_v34  ;;  %vm377_vm15 = vcmp.eq.f32.partialorder %v1079_v55, %v1124_v35  ;;  %v820_v53 = vpop.eup %819  ;;  %v239_v54 = vsel %vm181_vm0, %v816_v48, 0.0  ;;  %v242_v55 = vsel %vm181_vm0, %v818_v50, 0.0 }
 0x140   : > { %v363_v39 = vsel %vm362_vm14, %v358_v36, inf  ;;  %v378_v40 = vsel %vm377_vm15, %v373_v37, inf  ;;  %v822_v56 = vpop.eup %821  ;;  %v367_v41 = vcvt.f32.s32 %v1122_v34  ;;  %v382_v50 = vcvt.f32.s32 %v1124_v35 }
 0x141   : > { %364 = vmin.xlane.f32.xlu1 %v363_v39  ;;  %379 = vmin.xlane.f32.xlu0 %v378_v40  ;;  %v248_v58 = vsel %vm181_vm0, %v822_v56, 0.0  ;;  %v824_v59 = vpop.eup %823  ;;  %v176_v39 = vld [vmem:[%s1169_s29 + $0x18] sm:$0xff]  ;;  %v353_v40 = vshll.u32 %v352_v32, 16  ;;  %v435_v34 = vcvt.s32.f32 %v1013_v17  ;;  %v178_v56 = vld [vmem:[%s1169_s29 + $0x28] sm:$0xff]  ;;  %v179_v17 = vld [vmem:[%s1169_s29 + $0x30] sm:$0xff] }
 0x142   : > { %v1131_v42 = vpop.xlane.xlu1 %390  ;;  %v251_v60 = vsel %vm181_vm0, %v824_v59, 0.0  ;;  %v368_v48 = vshll.u32 %v367_v41, 16 }
 0x143   : > { %vm392_vm1 = vcmp.eq.f32.partialorder %v1084_v57, %v1131_v42  ;;  %v245_v57 = vsel %vm181_vm0, %v820_v53, 0.0  ;;  %v437_v63 = vadd.f32 1.0, %v435_v34 }
 0x144   : > { %v393_v45 = vsel %vm392_vm1, %v388_v43, inf }
 0x145   : > { %394 = vmin.xlane.f32.xlu1 %v393_v45  ;;  %231 = vadd.xlane.f32.xlu0 %v230_v46 }
 0x149   : > { %234 = vadd.xlane.f32.xlu1 %v233_v51  ;;  %237 = vadd.xlane.f32.xlu0 %v236_v52 }
 0x14d   : > { %240 = vadd.xlane.f32.xlu1 %v239_v54  ;;  %243 = vadd.xlane.f32.xlu0 %v242_v55 }
 0x151   : > { %246 = vadd.xlane.f32.xlu1 %v245_v57  ;;  %249 = vadd.xlane.f32.xlu0 %v248_v58  ;;  %v383_v57 = vshll.u32 %v382_v50, 16  ;;  %v397_v58 = vcvt.f32.s32 %v1131_v42 }
 0x153   : > { %v398_v16 = vshll.u32 %v397_v58, 16 }
 0x155   : > { %252 = vadd.xlane.f32.xlu1 %v251_v60 }
 0x1be   : > { %v290_v1 = vpop.xlane.xlu0 %289 }
 0x1bf   : > { %v291_v15 = vcvt.f32.s32 %v290_v1  ;;  %v419_v1 = vadd.s32 %v1151_v4, %v1147_v62 }
 0x1c1   : > { %v294_v18 = vadd.s32 %v293_v14, %v291_v15  ;;  %v411_v14 = vadd.s32 8, %v1147_v62  ;;  %vm427_vm8 = vcmp.lt.s32.totalorder %v419_v1, 100 }
 0x1c2   : > { %v320_v21 = vpop.xlane.xlu0 %319  ;;  %v305_v8 = vpop.xlane.xlu1 %304 }
 0x1c3   : > { %vm400_vm0 = vcmp.eq.s32.totalorder %v294_v18, %v173_v2  ;;  %v321_v61 = vcvt.f32.s32 %v320_v21  ;;  %v306_v28 = vcvt.f32.s32 %v305_v8  ;;  %v1195_v2 = vmul.f32 0.06666667, %v435_v34  ;;  %v180_v21 = vld [vmem:[%s1169_s29 + $0x38] sm:$0xff] }
 0x1c4   : > { %v503_v22 = vsel %vm400_vm0, 1, %v903_v49  ;;  %v1197_v18 = vmul.f32 0.06666667, %v437_v63 }
 0x1c5   : > { %512 = vperm.xlu0 %792, %v503_v22   ;;  %v309_v30 = vadd.s32 %v308_v23, %v306_v28  ;;  %v324_v9 = vadd.s32 %v323_v24, %v321_v61  ;;  %v412_v61 = vadd.s32 16, %v1147_v62  ;;  %v420_v23 = vadd.s32 %v1151_v4, %v411_v14 }
 0x1c6   : > { %v335_v19 = vpop.xlane.xlu1 %334  ;;  %v350_v12 = vpop.xlane.xlu0 %349  ;;  %v414_v24 = vadd.s32 32, %v1147_v62 }
 0x1c7   : > { %v336_v33 = vcvt.f32.s32 %v335_v19  ;;  %vm401_vm2 = vcmp.eq.s32.totalorder %v309_v30, %v174_v29  ;;  %v351_v38 = vcvt.f32.s32 %v350_v12  ;;  %vm402_vm3 = vcmp.eq.s32.totalorder %v324_v9, %v175_v11 }
 0x1c8   : > { %v504_v36 = vsel %vm401_vm2, 1, %v903_v49  ;;  %v505_v43 = vsel %vm402_vm3, 1, %v903_v49  ;;  %v421_v28 = vadd.s32 %v1151_v4, %v412_v61  ;;  %v413_v29 = vadd.s32 24, %v1147_v62 }
 0x1c9   : > { %v339_v37 = vadd.s32 %v338_v31, %v336_v33  ;;  %515 = vperm.xlu1 %793, %v504_v36   ;;  %v354_v44 = vadd.s32 %v353_v40, %v351_v38  ;;  %v904_v19 = vmov 0.0   ;;  %vm428_vm14 = vcmp.lt.s32.totalorder %v420_v23, 100 }
 0x1ca   : > { %v365_v25 = vpop.xlane.xlu1 %364  ;;  %v380_v13 = vpop.xlane.xlu0 %379  ;;  %v423_v31 = vadd.s32 %v1151_v4, %v414_v24  ;;  %vm429_vm2 = vcmp.lt.s32.totalorder %v421_v28, 100 }
 0x1cb   : > { %v366_v45 = vcvt.f32.s32 %v365_v25  ;;  %vm403_vm4 = vcmp.eq.s32.totalorder %v339_v37, %v176_v39  ;;  %v381_v53 = vcvt.f32.s32 %v380_v13  ;;  %vm404_vm5 = vcmp.eq.s32.totalorder %v354_v44, %v177_v47 }
 0x1cc   : > { %v506_v51 = vsel %vm403_vm4, 1, %v903_v49  ;;  %v507_v35 = vsel %vm404_vm5, 1, %v903_v49 }
 0x1cd   : > { %518 = vperm.xlu1 %793, %v505_v43   ;;  %v369_v52 = vadd.s32 %v368_v48, %v366_v45  ;;  %v384_v59 = vadd.s32 %v383_v57, %v381_v53 }
 0x1ce   : > { %v395_v26 = vpop.xlane.xlu1 %394  ;;  %v232_v46 = vpop.xlane.xlu0 %231 }
 0x1cf   : > { %825 = vrcp.f32 %v232_v46  ;;  %v396_v60 = vcvt.f32.s32 %v395_v26  ;;  %vm405_vm6 = vcmp.eq.s32.totalorder %v369_v52, %v178_v56  ;;  %vm406_vm7 = vcmp.eq.s32.totalorder %v384_v59, %v179_v17 }
 0x1d0   : > { %v508_v42 = vsel %vm405_vm6, 1, %v903_v49  ;;  %v509_v8 = vsel %vm406_vm7, 1, %v903_v49 }
 0x1d1   : > { %521 = vperm.xlu1 %793, %v506_v51   ;;  %v399_v15 = vadd.s32 %v398_v16, %v396_v60 }
 0x1d2   : > { %v235_v54 = vpop.xlane.xlu1 %234  ;;  %v238_v55 = vpop.xlane.xlu0 %237 }
 0x1d3   : > { %827 = vrcp.f32 %v235_v54  ;;  %vm407_vm9 = vcmp.eq.s32.totalorder %v399_v15, %v180_v21 }
 0x1d4   : > { %829 = vrcp.f32 %v238_v55  ;;  %v510_v9 = vsel %vm407_vm9, 1, %v903_v49  ;;  %v422_v49 = vadd.s32 %v1151_v4, %v413_v29 }
 0x1d5   : > { %524 = vperm.xlu1 %793, %v507_v35  }
 0x1d6   : > { %v241_v3 = vpop.xlane.xlu1 %240  ;;  %v244_v10 = vpop.xlane.xlu0 %243 }
 0x1d7   : > { %831 = vrcp.f32 %v241_v3 }
 0x1d8   : > { %833 = vrcp.f32 %v244_v10 }
 0x1d9   : > { %527 = vperm.xlu1 %793, %v508_v42  }
 0x1da   : > { %v247_v20 = vpop.xlane.xlu1 %246  ;;  %v250_v5 = vpop.xlane.xlu0 %249 }
 0x1db   : > { %835 = vrcp.f32 %v247_v20 }
 0x1dc   : > { %v826_v22 = vpop.eup %825  ;;  %837 = vrcp.f32 %v250_v5 }
 0x1dd   : > { %530 = vperm.xlu1 %793, %v509_v8   ;;  %vm439_vm10 = vcmp.gt.f32.partialorder %v826_v22, %v1195_v2  ;;  %vm447_vm11 = vcmp.le.f32.partialorder %v826_v22, %v1197_v18 }
 0x1de   : > { %v253_v27 = vpop.xlane.xlu1 %252  ;;  %vm455_vm12 = vmand %vm439_vm10, %vm447_vm11 }
 0x1df   : > { %839 = vrcp.f32 %v253_v27  ;;  %vm479_vm13 = vmand %vm455_vm12, %vm427_vm8  ;;  %vm431_vm8 = vcmp.lt.s32.totalorder %v423_v31, 100 }
 0x1e0   : > { %v828_v30 = vpop.eup %827  ;;  %v1211_v12 = vsel %vm479_vm13, 1.0, %v904_v19  ;;  %vm430_vm13 = vcmp.lt.s32.totalorder %v422_v49, 100 }
 0x1e1   : > { %v830_v11 = vpop.eup %829  ;;  %533 = vperm.xlu1 %793, %v510_v9   ;;  %vm440_vm15 = vcmp.gt.f32.partialorder %v828_v30, %v1195_v2  ;;  %vm448_vm1 = vcmp.le.f32.partialorder %v828_v30, %v1197_v18  ;;  %v495_v62 = vmul.f32 %v826_v22, %v1211_v12 }
 0x1e2   : > { %vm456_vm0 = vmand %vm440_vm15, %vm448_vm1  ;;  %vm441_vm3 = vcmp.gt.f32.partialorder %v830_v11, %v1195_v2  ;;  %vm449_vm4 = vcmp.le.f32.partialorder %v830_v11, %v1197_v18 }
 0x1e3   : > { %vm480_vm5 = vmand %vm456_vm0, %vm428_vm14  ;;  %vm432_vm0 = vcmp.lt.s32.totalorder %v1154_v6, 100 }
 0x1e4   : > { %v832_v32 = vpop.eup %831  ;;  %v1221_v33 = vsel %vm480_vm5, 1.0, %v904_v19  ;;  %vm457_vm6 = vmand %vm441_vm3, %vm449_vm4 }
 0x1e5   : > { %v834_v36 = vpop.eup %833  ;;  %559 = vrot.lane.b32.xlu1 %v495_v62, %s905_s30  ;;  %v496_v37 = vmul.f32 %v828_v30, %v1221_v33  ;;  %vm481_vm7 = vmand %vm457_vm6, %vm429_vm2  ;;  %vm442_vm9 = vcmp.gt.f32.partialorder %v832_v32, %v1195_v2  ;;  %vm450_vm10 = vcmp.le.f32.partialorder %v832_v32, %v1197_v18  ;;  %vm433_vm2 = vcmp.lt.s32.totalorder %v1157_v7, 100 }
 0x1e6   : > { %v1228_v4 = vsel %vm481_vm7, 1.0, %v904_v19  ;;  %vm443_vm11 = vcmp.gt.f32.partialorder %v834_v36, %v1195_v2  ;;  %vm451_vm12 = vcmp.le.f32.partialorder %v834_v36, %v1197_v18  ;;  %vm458_vm14 = vmand %vm442_vm9, %vm450_vm10 }
 0x1e7   : > { %561 = vrot.lane.b32.xlu0 %v496_v37, %s905_s30  ;;  %vm459_vm15 = vmand %vm443_vm11, %vm451_vm12  ;;  %v497_v13 = vmul.f32 %v830_v11, %v1228_v4  ;;  %vm434_vm11 = vcmp.lt.s32.totalorder %v1161_v0, 100 }
 0x1e8   : > { %v836_v38 = vpop.eup %835  ;;  %vm483_vm1 = vmand %vm459_vm15, %vm431_vm8 }
 0x1e9   : > { %v838_v25 = vpop.eup %837  ;;  %v1237_v39 = vsel %vm483_vm1, 1.0, %v904_v19  ;;  %vm482_vm3 = vmand %vm458_vm14, %vm430_vm13  ;;  %vm444_vm4 = vcmp.gt.f32.partialorder %v836_v38, %v1195_v2  ;;  %vm452_vm5 = vcmp.le.f32.partialorder %v836_v38, %v1197_v18 }
 0x1ea   : > { %v499_v40 = vmul.f32 %v834_v36, %v1237_v39  ;;  %v1243_v41 = vsel %vm482_vm3, 1.0, %v904_v19  ;;  %vm460_vm6 = vmand %vm444_vm4, %vm452_vm5  ;;  %vm445_vm7 = vcmp.gt.f32.partialorder %v838_v25, %v1195_v2  ;;  %vm453_vm8 = vcmp.le.f32.partialorder %v838_v25, %v1197_v18 }
 0x1eb   : > { %563 = vrot.lane.b32.xlu0 %v497_v13, %s905_s30  ;;  %vm484_vm9 = vmand %vm460_vm6, %vm432_vm0  ;;  %v498_v44 = vmul.f32 %v832_v32, %v1243_v41 }
 0x1ec   : > { %v840_v6 = vpop.eup %839  ;;  %567 = vrot.lane.b32.xlu1 %v499_v40, %s905_s30  ;;  %v1250_v43 = vsel %vm484_vm9, 1.0, %v904_v19  ;;  %vm461_vm10 = vmand %vm445_vm7, %vm453_vm8  ;;  %vm615_vm9 = vcmask 121856  }
 0x1ed   : > { %vm485_vm12 = vmand %vm461_vm10, %vm433_vm2  ;;  %vm446_vm13 = vcmp.gt.f32.partialorder %v840_v6, %v1195_v2  ;;  %vm454_vm14 = vcmp.le.f32.partialorder %v840_v6, %v1197_v18  ;;  %v500_v55 = vmul.f32 %v836_v38, %v1250_v43  ;;  %vm624_vm10 = vcmask 244736  }
 0x1ee   : > { %v1259_v45 = vsel %vm485_vm12, 1.0, %v904_v19  ;;  %vm462_vm15 = vmand %vm446_vm13, %vm454_vm14  ;;  %vm655_vm12 = vcmask 360448  }
 0x1ef   : > { %565 = vrot.lane.b32.xlu0 %v498_v44, %s905_s30  ;;  %vm486_vm1 = vmand %vm462_vm15, %vm434_vm11  ;;  %v501_v63 = vmul.f32 %v838_v25, %v1259_v45  ;;  %vm633_vm11 = vcmask 367616  }
 0x1f0   : > { %v1263_v26 = vsel %vm486_vm1, 1.0, %v904_v19 }
 0x1f1   : > { %v502_v17 = vmul.f32 %v840_v6, %v1263_v26 }
 0x240   : > { %v513_v0 = vpop.permute.xlu0 %512 }
 0x241   : > { %vm535_vm0 = vcmp.eq.s32.totalorder %v513_v0, 1 }
 0x242   : > { %v543_v7 = vsel %vm535_vm0, %v1211_v12, 0.0 }
 0x244   : > { %v516_v46 = vpop.permute.xlu1 %515 }
 0x245   : > { %vm536_vm3 = vcmp.eq.s32.totalorder %v516_v46, 1 }
 0x246   : > { %v544_v47 = vsel %vm536_vm3, %v1221_v33, 0.0 }
 0x247   : > { %v794_v48 = vpack.i.bf16 %v544_v47, %v543_v7 }
 0x248   : > { %v519_v50 = vpop.permute.xlu1 %518 }
 0x249   : > { %795 = vrot.lane.b32.xlu1 %v794_v48, %s906_s3  ;;  %vm537_vm2 = vcmp.eq.s32.totalorder %v519_v50, 1 }
 0x24a   : > { %v545_v52 = vsel %vm537_vm2, %v1228_v4, 0.0 }
 0x24c   : > { %v522_v51 = vpop.permute.xlu1 %521 }
 0x24d   : > { %vm538_vm4 = vcmp.eq.s32.totalorder %v522_v51, 1 }
 0x24e   : > { %v546_v53 = vsel %vm538_vm4, %v1243_v41, 0.0 }
 0x24f   : > { %v799_v34 = vpack.i.bf16 %v546_v53, %v545_v52 }
 0x250   : > { %v525_v54 = vpop.permute.xlu1 %524 }
 0x251   : > { %800 = vrot.lane.b32.xlu1 %v799_v34, %s906_s3  ;;  %vm539_vm5 = vcmp.eq.s32.totalorder %v525_v54, 1 }
 0x252   : > { %v547_v57 = vsel %vm539_vm5, %v1237_v39, 0.0 }
 0x254   : > { %v528_v56 = vpop.permute.xlu1 %527 }
 0x255   : > { %vm540_vm6 = vcmp.eq.s32.totalorder %v528_v56, 1  ;;  %569 = vrot.lane.b32.xlu1 %v500_v55, %s905_s30 }
 0x256   : > { %v548_v58 = vsel %vm540_vm6, %v1250_v43, 0.0 }
 0x257   : > { %v804_v35 = vpack.i.bf16 %v548_v58, %v547_v57 }
 0x258   : > { %v531_v59 = vpop.permute.xlu1 %530 }
 0x259   : > { %vm541_vm7 = vcmp.eq.s32.totalorder %v531_v59, 1  ;;  %805 = vrot.lane.b32.xlu0 %v804_v35, %s906_s3  ;;  %v562_v42 = vpop.permute.xlu0 %561 }
 0x25a   : > { %v549_v60 = vsel %vm541_vm7, %v1259_v45, 0.0  ;;  %v617_v20 = vsel %vm615_vm9, %v1221_v33, %v562_v42 }
 0x25b   : > { %603 = vrot.lane.b32.xlu1 %v549_v60, %s906_s3 }
 0x25c   : > { %v534_v3 = vpop.permute.xlu1 %533 }
 0x25d   : > { %vm542_vm8 = vcmp.eq.s32.totalorder %v534_v3, 1  ;;  %571 = vrot.lane.b32.xlu0 %v501_v63, %s905_s30  ;;  %v564_v18 = vpop.permute.xlu0 %563 }
 0x25e   : > { %v550_v10 = vsel %vm542_vm8, %v1263_v26, 0.0  ;;  %v618_v23 = vsel %vm615_vm9, %v1228_v4, %v564_v18 }
 0x25f   : > { %605 = vrot.lane.b32.xlu1 %v550_v10, %s906_s3 }
 0x260   : > { %v560_v16 = vpop.permute.xlu1 %559 }
 0x261   : > { %573 = vrot.lane.b32.xlu0 %v502_v17, %s905_s30  ;;  %v616_v5 = vsel %vm615_vm9, %v1211_v12, %v560_v16  ;;  %v566_v28 = vpop.permute.xlu0 %565 }
 0x262   : > { %v619_v12 = vsel %vm615_vm9, %v1243_v41, %v566_v28 }
 0x264   : > { %v568_v1 = vpop.permute.xlu1 %567 }
 0x265   : > { %v620_v36 = vsel %vm615_vm9, %v1237_v39, %v568_v1 }
 0x2bb   : > { %v796_v14 = vpop.permute.xlu1 %795 }
 0x2bc   : > { %v798_v15 = vunpack.i.h.bf16 %v796_v14  ;;  %v797_v2 = vunpack.i.l.bf16 %v796_v14 }
 0x2be   : > { %v625_v21 = vsel %vm624_vm10, %v616_v5, %v797_v2  ;;  %v626_v61 = vsel %vm624_vm10, %v617_v20, %v798_v15 }
 0x2bf   : > { %v634_v24 = vsel %vm633_vm11, %v625_v21, 0.0  ;;  %v635_v27 = vsel %vm633_vm11, %v626_v61, 0.0 }
 0x2c0   : > { %v636_v19 = vadd.f32 %v635_v27, %v634_v24 }
 0x2c3   : > { %v801_v22 = vpop.permute.xlu1 %800 }
 0x2c4   : > { %v802_v8 = vunpack.i.l.bf16 %v801_v22  ;;  %v803_v29 = vunpack.i.h.bf16 %v801_v22 }
 0x2c6   : > { %v627_v30 = vsel %vm624_vm10, %v618_v23, %v802_v8  ;;  %v628_v11 = vsel %vm624_vm10, %v619_v12, %v803_v29 }
 0x2c7   : > { %v637_v9 = vsel %vm633_vm11, %v627_v30, 0.0  ;;  %v570_v49 = vpop.permute.xlu1 %569  ;;  %v639_v37 = vsel %vm633_vm11, %v628_v11, 0.0 }
 0x2c8   : > { %v638_v31 = vadd.f32 %v637_v9, %v636_v19  ;;  %v621_v4 = vsel %vm615_vm9, %v1250_v43, %v570_v49 }
 0x2ca   : > { %v640_v38 = vadd.f32 %v639_v37, %v638_v31 }
 0x2cb   : > { %v806_v62 = vpop.permute.xlu0 %805 }
 0x2cc   : > { %v808_v32 = vunpack.i.h.bf16 %v806_v62  ;;  %v807_v33 = vunpack.i.l.bf16 %v806_v62 }
 0x2cd   : > { %v604_v40 = vpop.permute.xlu1 %603 }
 0x2ce   : > { %v630_v25 = vsel %vm624_vm10, %v621_v4, %v808_v32  ;;  %v629_v13 = vsel %vm624_vm10, %v620_v36, %v807_v33 }
 0x2cf   : > { %v641_v41 = vsel %vm633_vm11, %v629_v13, 0.0  ;;  %v572_v6 = vpop.permute.xlu0 %571  ;;  %v643_v39 = vsel %vm633_vm11, %v630_v25, 0.0 }
 0x2d0   : > { %v642_v44 = vadd.f32 %v641_v41, %v640_v38  ;;  %v622_v0 = vsel %vm615_vm9, %v1259_v45, %v572_v6 }
 0x2d1   : > { %v631_v46 = vsel %vm624_vm10, %v622_v0, %v604_v40  ;;  %v606_v50 = vpop.permute.xlu1 %605 }
 0x2d2   : > { %v644_v43 = vadd.f32 %v643_v39, %v642_v44  ;;  %v645_v7 = vsel %vm633_vm11, %v631_v46, 0.0 }
 0x2d3   : > { %v574_v47 = vpop.permute.xlu0 %573 }
 0x2d4   : > { %v646_v48 = vadd.f32 %v645_v7, %v644_v43  ;;  %v623_v51 = vsel %vm615_vm9, %v1263_v26, %v574_v47 }
 0x2d5   : > { %v632_v52 = vsel %vm624_vm10, %v623_v51, %v606_v50 }
 0x2d6   : > { %v647_v53 = vsel %vm633_vm11, %v632_v52, 0.0 }
 0x2d7   : > { %v648_v34 = vadd.f32 %v647_v53, %v646_v48 }
 0x2d9   : > { %v649_v45 = vrot.slane %v648_v34, 4 }
 0x2db   : > { %v650_v54 = vadd.f32 %v649_v45, %v648_v34 }
 0x2dd   : > { %v651_v55 = vrot.slane %v650_v54, 2 }
 0x2df   : > { %v652_v56 = vadd.f32 %v651_v55, %v650_v54 }
 0x2e1   : > { %v653_v57 = vrot.slane %v652_v56, 1 }
 0x2e3   : > { %v654_v58 = vadd.f32 %v653_v57, %v652_v56 }
 0x2e5   : > { %656 = vst.msk [vmem:[%s152_s6] sm:$0x1] %vm655_vm12, %v654_v58 }
 0x2e6   : > { %854 = shalt.err (!%p851_p3)
}
 0x2e7   : > { %s855_s24 = scalar_lea.hbm %s668_s16, 16  ;;  %s859_s27 = scalar_lea.hbm %s1347_s2, 32 }
 0x2e8   : > { %p856_p4 = scmp.ne.s32.totalorder %s668_s16, %s855_s24  ;;  %p860_p9 = scmp.lt.s32.totalorder %s668_s16, %s1347_s2 }
 0x2e9   : > { %p861_p10 = scmp.lt.s32.totalorder %s859_s27, %s855_s24 }
 0x2ea   : > { %p857_p7 = pnand %p856_p4, %p961_p5 }
 0x2eb   : > { %p862_p11 = por %p861_p10, %p860_p9 }
 0x2ec   : > { %p858_p8 = pneg %p857_p7 }
 0x2ee   : > { %p863_p12 = pnand %p862_p11, %p858_p8 }
 0x2f0   : > { %866 = shalt.err (!%p863_p12)
}
 0x2f1   : > { %749 = dma.vmem_to_hbm [thread:$0]  (%p961_p5), %s671_s7, 16, %s668_s16, %s658_s17  }
 0x2f2 PF: > { %p755_p13 = scmp.ge.s32.totalorder %s901_s12, 2  ;;  %s682_s30 = sand.u32 1, %s889_s9  }
 0x2f3   : > { %s683_s3 = scalar_lea.sflag [#allocation3], %s682_s30 }
 0x2f4   : > { %p752_p0 = pnand %p755_p13, %p965_p6 }
 0x2f6   : > { %p753_p1 = pneg %p752_p0 }
 0x2f8   : > { %884 = dma.done.wait (%p753_p1), %s683_s3, 16  }
 0x2f9   : > { %886 = vsyncadd (%p753_p1), %s683_s3, 4294967280  ;;  %p12_p2 = scmp.ge.s32.totalorder %s948_s15, 4   ;;  %s1350_s9 = smov %s893_s10 }
 0x2fa   : > { %s1351_s10 = smov %s897_s11  ;;  %s1352_s11 = smov %s959_s18 }
 0x2fb   : > { %s1353_s12 = smov %s948_s15  ;;  %14 = sbr.rel (!%p12_p2) target bundleno = 3 (0x3), region = 66 }
 0x300   :  { %687 = vsyncpa [#allocation3], 1 }
 0x301   :  { %689 = vsyncpa [#allocation3 + $0x1], 1 }

</bundles_post_ra>
